<compile_context>
chip_gen: v5e
topology: v5e:2x2
jax: 0.10.0
libtpu: 0.0.40
codegen_flags: <defaults>
</compile_context>

<pallas_src>
import functools

import jax
import jax.numpy as jnp
from jax.experimental import pallas as pl
from jax.experimental.pallas import tpu as pltpu

_LANES = 128
# 2048 rows * 128 lanes * 4 B = 1 MiB per f32 input tile.  2 inputs x 2
# pipeline buffers = 4 MiB of pipelined VMEM.
_MAX_TILE_ROWS = 2048


def _round_up(x, m):
    return ((x + m - 1) // m) * m


def _sublane_min(dtype):
    # Packed-tile minimum second-minor size: 8 for 4-byte, 16 for 2-byte,
    # 32 for 1-byte dtypes.
    return max(8, 32 // jnp.dtype(dtype).itemsize)


def _bce_terms(p, y):
    """Un-negated elementwise BCE contribution, with torch's -100 log clamp."""
    p = p.astype(jnp.float32)
    y = y.astype(jnp.float32)
    log_p = jnp.maximum(jnp.log(p), -100.0)
    log_1mp = jnp.maximum(jnp.log1p(-p), -100.0)
    # loss = -(y*log_p + (1-y)*log_1mp) = -(log_1mp + y*(log_p - log_1mp))
    return log_1mp + y * (log_p - log_1mp)


def _bce_sum_kernel(p_ref, y_ref, o_ref, *, tile_rows, steps, n_tiles, guard):
    c = pl.program_id(0)   # "parallel" axis (per-core slab)
    s = pl.program_id(1)   # "arbitrary" reduction axis

    # The (8,128) f32 output block is resident across the reduction axis and
    # acts as a vector accumulator; zero it at the start of each core slab.
    @pl.when(s == 0)
    def _():
        o_ref[...] = jnp.zeros_like(o_ref)

    def _accumulate():
        contrib = _bce_terms(p_ref[...], y_ref[...])
        # Sublane-fold into the (8,128) accumulator: pure VALU adds, no
        # per-step cross-lane (XLU) reduction.
        o_ref[...] += contrib.reshape(tile_rows // 8, 8, _LANES).sum(axis=0)

    if guard:
        # Uneven tiles-per-core split: the overhang grid step re-reads the
        # last valid tile (clamped index_map) and is simply skipped here.
        pl.when(c * steps + s < n_tiles)(_accumulate)
    else:
        _accumulate()


def quantum_loss_function(predictions, targets):
    """BCELoss(reduction='mean') forward, matching torch semantics."""
    assert predictions.shape == targets.shape
    n_elems = predictions.size

    p_flat = predictions.reshape(-1)
    y_flat = targets.reshape(-1)

    sub = max(_sublane_min(predictions.dtype), _sublane_min(targets.dtype))
    rows_needed = pl.cdiv(n_elems, _LANES)
    if rows_needed <= _MAX_TILE_ROWS:
        tile_rows = _round_up(max(rows_needed, sub), sub)
    else:
        tile_rows = _MAX_TILE_ROWS
    tile_elems = tile_rows * _LANES

    tail_sum = jnp.float32(0.0)
    if n_elems % tile_elems == 0:
        # Perfectly tile-aligned: zero-copy reshape, no pad, no tail.
        n_tiles = n_elems // tile_elems
        p2 = p_flat.reshape(n_tiles * tile_rows, _LANES)
        y2 = y_flat.reshape(n_tiles * tile_rows, _LANES)
    elif n_elems < tile_elems:
        # Small ragged input: pad the single (tiny) tile with p=1, y=1 -- with
        # the -100 clamp each pad element contributes exactly 0, so no
        # in-kernel masking and no wrapper correction is needed.
        n_tiles = 1
        pad = tile_elems - n_elems
        p2 = jnp.pad(p_flat, (0, pad), constant_values=1).reshape(tile_rows, _LANES)
        y2 = jnp.pad(y_flat, (0, pad), constant_values=1).reshape(tile_rows, _LANES)
    else:
        # Large, not tile-aligned: the grid covers only the complete tiles and
        # the (< one tile) overhang is folded in with plain jnp -- no
        # full-array pad copy on a memory-bound kernel.
        n_tiles = n_elems // tile_elems
        tail_start = n_tiles * tile_elems
        tail_sum = jnp.sum(_bce_terms(p_flat[tail_start:], y_flat[tail_start:]))
        if n_elems % _LANES == 0:
            # Zero-copy full reshape; the grid never reads the overhang rows.
            rows = n_elems // _LANES
            p2 = p_flat.reshape(rows, _LANES)
            y2 = y_flat.reshape(rows, _LANES)
        else:
            # Rare lane-ragged large input: one prefix-slice copy of the bulk.
            p2 = p_flat[:tail_start].reshape(n_tiles * tile_rows, _LANES)
            y2 = y_flat[:tail_start].reshape(n_tiles * tile_rows, _LANES)

    # Split the complete tiles across (up to) two core slabs.  Uneven splits
    # are handled by clamping the index_map and guarding the extra step
    # in-kernel (one redundant tile DMA instead of a full-array pad).
    n_cores = 2 if n_tiles >= 2 else 1
    steps = pl.cdiv(n_tiles, n_cores)
    guard = n_cores * steps != n_tiles

    if guard:
        def in_idx(c, s):
            return (jnp.minimum(c * steps + s, n_tiles - 1), 0)
    else:
        def in_idx(c, s):
            return (c * steps + s, 0)

    kernel = functools.partial(
        _bce_sum_kernel, tile_rows=tile_rows, steps=steps, n_tiles=n_tiles,
        guard=guard)

    partials = pl.pallas_call(
        kernel,
        out_shape=jax.ShapeDtypeStruct((n_cores * 8, _LANES), jnp.float32),
        grid_spec=pltpu.PrefetchScalarGridSpec(
            num_scalar_prefetch=0,
            grid=(n_cores, steps),
            in_specs=[
                pl.BlockSpec((tile_rows, _LANES), in_idx),
                pl.BlockSpec((tile_rows, _LANES), in_idx),
            ],
            out_specs=pl.BlockSpec((8, _LANES), lambda c, s: (c, 0)),
        ),
        # TODO(synk): if an xprof on v7x shows both core slabs running on one
        # TensorCore, switch the leading axis to pltpu.CORE_PARALLEL (or move
        # to pl.core_map + create_tensorcore_mesh with per-core partials).
        compiler_params=pltpu.CompilerParams(
            dimension_semantics=("parallel", "arbitrary")),
    )(p2, y2)

    # Raw (un-negated) sum -> negate + mean in the wrapper.
    return -(jnp.sum(partials) + tail_sum) / jnp.float32(n_elems)


if __name__ == "__main__":
    key = jax.random.PRNGKey(0)
    keys = jax.random.split(key, 6)

    def _ref_bce(p, y):
        p = p.astype(jnp.float32)
        y = y.astype(jnp.float32)
        return jnp.mean(-(y * jnp.maximum(jnp.log(p), -100.0)
                          + (1.0 - y) * jnp.maximum(jnp.log1p(-p), -100.0)))

    # Main case: NCHW classifier output (2, 4, 16, 16) -> 2048 elems
    # (tile-aligned, zero-copy, single grid step).
    shape = (2, 4, 16, 16)
    predictions = jax.nn.sigmoid(jax.random.normal(keys[0], shape, jnp.float32))
    targets = jax.random.bernoulli(keys[1], 0.5, shape).astype(jnp.float32)
    loss = jax.block_until_ready(quantum_loss_function(predictions, targets))
    ref = _ref_bce(predictions, targets)
    assert jnp.allclose(loss, ref, rtol=1e-5, atol=1e-6), (loss, ref)

    # Ragged small case: exercises the neutral (p=1, y=1) pad path.
    shape2 = (2, 3, 5, 7)   # 210 elems, not a multiple of 128
    p2 = jax.nn.sigmoid(jax.random.normal(keys[2], shape2, jnp.float32))
    y2 = jax.random.bernoulli(keys[3], 0.5, shape2).astype(jnp.float32)
    loss2 = jax.block_until_ready(quantum_loss_function(p2, y2))
    ref2 = _ref_bce(p2, y2)
    assert jnp.allclose(loss2, ref2, rtol=1e-5, atol=1e-6), (loss2, ref2)

    # Larger case: exercises the multi-tile grid, the uneven two-slab split
    # (3 full tiles -> clamped index_map + in-kernel guard) and the jnp tail.
    shape3 = (4, 1561, 128)   # 799,232 elems = 3 full 2048x128 tiles + tail
    p3 = jax.nn.sigmoid(jax.random.normal(keys[4], shape3, jnp.float32))
    y3 = jax.random.bernoulli(keys[5], 0.5, shape3).astype(jnp.float32)
    loss3 = jax.block_until_ready(quantum_loss_function(p3, y3))
    ref3 = _ref_bce(p3, y3)
    assert jnp.allclose(loss3, ref3, rtol=5e-4, atol=1e-5), (loss3, ref3)

    print("KERNEL_OK")
</pallas_src>

<mosaic_0001>
module attributes {stable_mosaic.version = 11 : i64} {
  func.func @_bce_sum_kernel(%arg0: i32, %arg1: i32, %arg2: memref<16x128xf32, #tpu.memory_space<vmem>>, %arg3: memref<16x128xf32, #tpu.memory_space<vmem>>, %arg4: memref<8x128xf32, #tpu.memory_space<vmem>>) attributes {dimension_semantics = [#tpu.dimension_semantics<parallel>, #tpu.dimension_semantics<arbitrary>], iteration_bounds = array<i64: 1, 1>, scalar_prefetch = 0 : i64, scratch_operands = 0 : i64, tpu.core_type = #tpu.core_type<tc>, window_params = [{transform_indices = @transform_0, window_bounds = array<i64: 16, 128>}, {transform_indices = @transform_1, window_bounds = array<i64: 16, 128>}, {transform_indices = @transform_2, window_bounds = array<i64: 8, 128>}]} {
    %c0_i32 = arith.constant 0 : i32
    %0 = arith.cmpi eq, %arg1, %c0_i32 : i32
    %1 = arith.extui %0 : i1 to i32
    %c0_i32_0 = arith.constant 0 : i32
    %2 = arith.cmpi ne, %1, %c0_i32_0 : i32
    scf.if %2 {
      %cst_11 = arith.constant 0.000000e+00 : f32
      %21 = vector.broadcast %cst_11 : f32 to vector<8x128xf32>
      %c0_12 = arith.constant 0 : index
      %c0_13 = arith.constant 0 : index
      %22 = vector.load %arg4[%c0_12, %c0_13] : memref<8x128xf32, #tpu.memory_space<vmem>>, vector<8x128xf32>
      tpu.vector_store %arg4[%c0_12, %c0_13], %21 {strides = array<i32>} : memref<8x128xf32, #tpu.memory_space<vmem>>, vector<8x128xf32>,
    } else {
    }
    %c0 = arith.constant 0 : index
    %c0_1 = arith.constant 0 : index
    %3 = vector.load %arg2[%c0, %c0_1] : memref<16x128xf32, #tpu.memory_space<vmem>>, vector<16x128xf32>
    %c0_2 = arith.constant 0 : index
    %c0_3 = arith.constant 0 : index
    %4 = vector.load %arg3[%c0_2, %c0_3] : memref<16x128xf32, #tpu.memory_space<vmem>>, vector<16x128xf32>
    %5 = math.log %3 : vector<16x128xf32>
    %cst = arith.constant -1.000000e+02 : f32
    %6 = vector.broadcast %cst : f32 to vector<16x128xf32>
    %7 = arith.maximumf %5, %6 : vector<16x128xf32>
    %cst_4 = arith.constant 0.000000e+00 : f32
    %8 = vector.broadcast %cst_4 : f32 to vector<16x128xf32>
    %9 = arith.subf %8, %3 : vector<16x128xf32>
    %10 = math.log1p %9 : vector<16x128xf32>
    %cst_5 = arith.constant -1.000000e+02 : f32
    %11 = vector.broadcast %cst_5 : f32 to vector<16x128xf32>
    %12 = arith.maximumf %10, %11 : vector<16x128xf32>
    %13 = arith.subf %7, %12 : vector<16x128xf32>
    %14 = arith.mulf %4, %13 : vector<16x128xf32>
    %15 = arith.addf %12, %14 : vector<16x128xf32>
    %c0_6 = arith.constant 0 : index
    %c0_7 = arith.constant 0 : index
    %16 = vector.load %arg4[%c0_6, %c0_7] : memref<8x128xf32, #tpu.memory_space<vmem>>, vector<8x128xf32>
    %17 = vector.shape_cast %15 : vector<16x128xf32> to vector<2x8x128xf32>
    %cst_8 = arith.constant dense<0.000000e+00> : vector<8x128xf32>
    %18 = vector.multi_reduction <add>, %17, %cst_8 [0] : vector<2x8x128xf32> to vector<8x128xf32>
    %19 = arith.addf %16, %18 : vector<8x128xf32>
    %c0_9 = arith.constant 0 : index
    %c0_10 = arith.constant 0 : index
    %20 = vector.load %arg4[%c0_9, %c0_10] : memref<8x128xf32, #tpu.memory_space<vmem>>, vector<8x128xf32>
    tpu.vector_store %arg4[%c0_9, %c0_10], %19 {strides = array<i32>} : memref<8x128xf32, #tpu.memory_space<vmem>>, vector<8x128xf32>,
    return
  }
  func.func @transform_0(%arg0: i32, %arg1: i32) -> (i32, i32) {
    %c1_i32 = arith.constant 1 : i32
    %0 = arith.muli %arg0, %c1_i32 : i32
    %1 = arith.addi %0, %arg1 : i32
    %c0_i32 = arith.constant 0 : i32
    %c0_i32_0 = arith.constant 0 : i32
    return %1, %c0_i32 : i32, i32
  }
  func.func @transform_1(%arg0: i32, %arg1: i32) -> (i32, i32) {
    %c1_i32 = arith.constant 1 : i32
    %0 = arith.muli %arg0, %c1_i32 : i32
    %1 = arith.addi %0, %arg1 : i32
    %c0_i32 = arith.constant 0 : i32
    %c0_i32_0 = arith.constant 0 : i32
    return %1, %c0_i32 : i32, i32
  }
  func.func @transform_2(%arg0: i32, %arg1: i32) -> (i32, i32) {
    %c0_i32 = arith.constant 0 : i32
    %c0_i32_0 = arith.constant 0 : i32
    return %arg0, %c0_i32 : i32, i32
  }
}

</mosaic_0001>

<bundles_post_ra>
// kernel: tpu_custom_call.1
= control target key start
LH: loop header
LB: loop body
LE: loop exit
PB: predicated region body
PF: predicated region fallthrough
CT: control target
= control target key end

     0   :  { %7 = vsyncpa [#allocation3], 0  ;;  %s242_s0 = inlined_call_operand.hbm [shape: f32[16,128], index: 0, kind: input, shape index: {}]   ;;  %s243_s1 = inlined_call_operand.hbm [shape: f32[16,128], index: 1, kind: input, shape index: {}]   ;;  %s244_s2 = inlined_call_operand.hbm [shape: f32[8,128], index: 2, kind: output, shape index: {}]  }
   0x1   :  { %8 = vsyncpa [#allocation6], 0 }
   0x2   :  { %9 = vsyncpa [#allocation4], 0  ;;  %s18_s11 = sshll.u32 %s242_s0, 4  ;;  %s213_s12 = smov [#allocation2]   ;;  %s19_s11 = int_to_ptr.hbm [resolvable:$true] %s18_s11 }
   0x3   :  { %s20_s13 = sshll.u32 %s213_s12, 4  ;;  %s35_s16 = sshll.u32 %s243_s1, 4  ;;  %s21_s13 = int_to_ptr.vmem [resolvable:$true] %s20_s13  ;;  %s36_s16 = int_to_ptr.hbm [resolvable:$true] %s35_s16 }
   0x4   :  { %s214_s17 = smov 128   ;;  %s215_s18 = smov 8  }
   0x5   :  { %26 = dma.hbm_to_vmem [thread:$0]  %s19_s11, 256, %s21_s13, [#allocation3], %s214_s17, %s214_s17, %s215_s18  }
   0x6   :  { %s216_s19 = smov [#allocation5]  }
   0x7   :  { %s37_s20 = sshll.u32 %s216_s19, 4  ;;  %s38_s20 = int_to_ptr.vmem [resolvable:$true] %s37_s20 }
   0x8   :  { %43 = dma.hbm_to_vmem [thread:$0]  %s36_s16, 256, %s38_s20, [#allocation6], %s214_s17, %s214_s17, %s215_s18  }
   0x9   :  { %207 = dma.done.wait [#allocation3], 256  }
   0xa   :  { %208 = vsyncadd [#allocation3], 4294967040 }
   0xb   :  { %209 = dma.done.wait [#allocation6], 256  }
   0xc   :  { %210 = vsyncadd [#allocation6], 4294967040  ;;  %v61_v0 = vld [vmem:[#allocation2] sm:$0xff]  ;;  %v62_v1 = vld [vmem:[#allocation2 + $0x8] sm:$0xff]  ;;  %s217_s0 = smov [#allocation7]   ;;  %s110_s23 = sshll.u32 %s244_s2, 4  ;;  %s111_s23 = int_to_ptr.hbm [resolvable:$true] %s110_s23 }
   0xd   :  { %127 = vlog2.f32 %v61_v0  ;;  %v71_v2 = vsub.f32 0.0, %v61_v0  ;;  %v72_v3 = vsub.f32 0.0, %v62_v1  ;;  %v63_v27 = vld [vmem:[#allocation5] sm:$0xff]  ;;  %v64_v29 = vld [vmem:[#allocation5 + $0x8] sm:$0xff]  ;;  %s108_s1 = sshll.u32 %s217_s0, 4  ;;  %s109_s1 = int_to_ptr.vmem [resolvable:$true] %s108_s1 }
   0xe   :  { %129 = vlog2.f32 %v62_v1 }
   0xf   :  { %v73_v4 = vadd.f32 1.0, %v71_v2  ;;  %v76_v5 = vmul.f32 -0.5, %v71_v2  ;;  %v82_v6 = vadd.f32 1.0, %v72_v3  ;;  %v85_v7 = vmul.f32 -0.5, %v72_v3 }
  0x10   :  { %v79_v10 = vand.u32 2147483647, %v71_v2  ;;  %v88_v13 = vand.u32 2147483647, %v72_v3 }
  0x11   :  { %131 = vlog2.f32 %v73_v4  ;;  %v77_v8 = vadd.f32 1.0, %v76_v5  ;;  %v86_v11 = vadd.f32 1.0, %v85_v7 }
  0x12   :  { %133 = vlog2.f32 %v82_v6  ;;  %vm80_vm0 = vcmp.lt.f32.partialorder %v79_v10, 0.0004427343  ;;  %vm89_vm1 = vcmp.lt.f32.partialorder %v88_v13, 0.0004427343 }
  0x13   :  { %v128_v9 = vpop.eup %127  ;;  %v78_v16 = vmul.f32 %v77_v8, %v71_v2  ;;  %v87_v18 = vmul.f32 %v86_v11, %v72_v3 }
  0x14   :  { %v130_v12 = vpop.eup %129  ;;  %v66_v14 = vmul.f32 0.6931472, %v128_v9 }
  0x15   :  { %v68_v15 = vmul.f32 0.6931472, %v130_v12 }
  0x16   :  { %v69_v21 = vmax.f32 %v66_v14, -100.0 }
  0x17   :  { %v132_v17 = vpop.eup %131  ;;  %v70_v23 = vmax.f32 %v68_v15, -100.0 }
  0x18   :  { %v134_v19 = vpop.eup %133  ;;  %v75_v20 = vmul.f32 0.6931472, %v132_v17 }
  0x19   :  { %v84_v22 = vmul.f32 0.6931472, %v134_v19 }
  0x1a   :  { %v81_v24 = vsel %vm80_vm0, %v78_v16, %v75_v20 }
  0x1b   :  { %v90_v25 = vsel %vm89_vm1, %v87_v18, %v84_v22  ;;  %v91_v26 = vmax.f32 %v81_v24, -100.0 }
  0x1c   :  { %v92_v28 = vmax.f32 %v90_v25, -100.0 }
  0x1d   :  { %v93_v30 = vsub.f32 %v69_v21, %v91_v26 }
  0x1e   :  { %v94_v31 = vsub.f32 %v70_v23, %v92_v28 }
  0x1f   :  { %v95_v32 = vmul.f32 %v93_v30, %v63_v27 }
  0x20   :  { %v96_v33 = vmul.f32 %v94_v31, %v64_v29 }
  0x21   :  { %v97_v34 = vadd.f32 %v95_v32, %v91_v26 }
  0x22   :  { %v98_v35 = vadd.f32 %v96_v33, %v92_v28 }
  0x24   :  { %v100_v36 = vadd.f32 %v98_v35, %v97_v34 }
  0x26   :  { %102 = vst [vmem:[#allocation7] sm:$0xff] %v100_v36 }
  0x27   :  { %113 = dma.vmem_to_hbm [thread:$0]  %s109_s1, 128, %s111_s23, [#allocation4]  }
  0x28   :  { %211 = dma.done.wait [#allocation4], 128  }
  0x29   :  { %212 = vsyncadd [#allocation4], 4294967168 }
  0x2a   :  { %118 = vsyncpa [#allocation3], 1 }
  0x2b   :  { %119 = vsyncpa [#allocation6], 1 }
  0x2c   :  { %120 = vsyncpa [#allocation4], 1 }

</bundles_post_ra>
